<compile_context>
chip_gen: v7x
topology: tpu7x:2x2x1
jax: 0.10.0
libtpu: 0.0.40
codegen_flags: <defaults>
</compile_context>

<pallas_src>
import math

import jax
import jax.numpy as jnp
from jax.experimental import pallas as pl
from jax.experimental.pallas import tpu as pltpu


def _attention_kernel(x_ref, mask_ref, o_ref):
    # x_ref:    (Hb, S, D) block for the current head-chunk
    # mask_ref: (1, S, S) pre-summed additive mask, broadcast over heads
    # o_ref:    (Hb, S, D)
    x = x_ref[...]                                   # (Hb, S, D)
    scale = 1.0 / math.sqrt(x.shape[-1])

    xb = x.astype(jnp.bfloat16)                      # rhs for both matmuls
    xq = (x * scale).astype(jnp.bfloat16)            # scaled lhs of QK^T
    xt = jnp.swapaxes(xb, -1, -2)                    # (Hb, D, S), one XLU pass

    # qk = (x * scale) @ x^T, batched over heads -> MXU, f32 accumulation
    qk = jnp.einsum("hsd,hdt->hst", xq, xt,
                    preferred_element_type=jnp.float32)          # (Hb, S, S)
    qk = qk + mask_ref[0]                            # (S,S) broadcasts over h

    # numerically-stable softmax, normalization deferred past the PV matmul
    qk_max = jnp.max(qk, axis=-1, keepdims=True)
    p = jnp.exp(qk - qk_max)                         # (Hb, S, S) unnormalized
    denom = jnp.sum(p, axis=-1, keepdims=True)       # (Hb, S, 1)

    out_un = jnp.einsum("hst,htd->hsd", p.astype(jnp.bfloat16), xb,
                        preferred_element_type=jnp.float32)      # (Hb, S, D)
    out = out_un * pl.reciprocal(denom, approx=True)             # EUP vrcp
    o_ref[...] = out.astype(o_ref.dtype)


def _pick_heads_per_block(B, H, S, D, itemsize,
                          vmem_budget=12 << 20, max_hb=32):
    """Largest head block that fits VMEM and keeps >= 4 grid steps (2/TC on v7x)."""
    total = B * H

    def vmem_est(hb):
        io = 4 * hb * S * D * itemsize               # double-buffered x + out
        tmp = 5 * hb * S * S * 4 + hb * S * D * 4    # f32/bf16 temporaries + slack
        return io + tmp + 2 * S * S * 4              # + mask

    divisors = [d for d in range(1, H + 1)
                if H % d == 0 and d <= max_hb and vmem_est(d) <= vmem_budget]
    if not divisors:
        return 1
    target_steps = min(4, total)                      # want >= 2 steps per v7x TC
    good = [d for d in divisors if total // d >= target_steps]
    return max(good) if good else max(divisors)


def attention_pallas(x, mask1, mask, heads_per_block=None):
    """x: (B, H, S, D);  mask1, mask: (1, S, S) additive masks."""
    B, H, S, D = x.shape
    itemsize = jnp.dtype(x.dtype).itemsize

    if heads_per_block is None:
        heads_per_block = _pick_heads_per_block(B, H, S, D, itemsize)
    while H % heads_per_block != 0:
        heads_per_block -= 1
    Hb = max(1, heads_per_block)

    # Pre-sum the two additive masks once in the wrapper (single XLA add).
    mask_sum = (mask1 + mask).astype(jnp.float32)     # (1, S, S)

    # Flatten batch & heads -> one flat parallel grid axis (free reshape).
    x_flat = x.reshape(B * H, S, D)
    num_blocks = (B * H) // Hb

    out_flat = pl.pallas_call(
        _attention_kernel,
        out_shape=jax.ShapeDtypeStruct((B * H, S, D), x.dtype),
        grid=(num_blocks,),
        in_specs=[
            pl.BlockSpec((Hb, S, D), lambda i: (i, 0, 0)),
            pl.BlockSpec((1, S, S), lambda i: (0, 0, 0)),
        ],
        out_specs=pl.BlockSpec((Hb, S, D), lambda i: (i, 0, 0)),
        compiler_params=pltpu.CompilerParams(
            dimension_semantics=("parallel",),
            vmem_limit_bytes=32 << 20,
        ),
    )(x_flat, mask_sum)
    return out_flat.reshape(B, H, S, D)


def attention_ref(x, mask1, mask):
    d = x.shape[-1]
    qk = jnp.einsum("bhsd,bhtd->bhst", x, x) / math.sqrt(d)
    qk = qk + mask1 + mask                           # (1,S,S) -> (B,H,S,S)
    attn = jax.nn.softmax(qk, axis=-1)
    return jnp.einsum("bhst,bhtd->bhsd", attn, x)


if __name__ == "__main__":
    # Small shapes consistent with the module (original is (1, 64, 56, 56)).
    B, H, S, D = 2, 8, 16, 16

    key = jax.random.PRNGKey(0)
    kx, km1, km = jax.random.split(key, 3)

    x = jax.random.normal(kx, (B, H, S, D), dtype=jnp.float32)

    # mask1 ~ additive mask with large negatives at "masked" positions
    mask1 = jnp.where(
        jax.random.uniform(km1, (1, S, S)) > 0.7,
        jnp.float32(-1e6),
        jnp.float32(0.0),
    )
    # second additive mask passed to forward()
    mask = 0.1 * jax.random.normal(km, (1, S, S), dtype=jnp.float32)

    out = attention_pallas(x, mask1, mask)
    out = jax.block_until_ready(out)

    ref = attention_ref(x, mask1, mask)
    # bf16 MXU inputs (f32 accumulation) + approx reciprocal -> relaxed tol.
    assert jnp.allclose(out, ref, atol=2e-2, rtol=2e-2), "mismatch vs reference"

    print("KERNEL_OK")
</pallas_src>

<mosaic_0001>
module attributes {stable_mosaic.version = 11 : i64} {
  func.func @_attention_kernel(%arg0: i32, %arg1: memref<4x16x16xf32, #tpu.memory_space<vmem>>, %arg2: memref<1x16x16xf32, #tpu.memory_space<vmem>>, %arg3: memref<4x16x16xf32, #tpu.memory_space<vmem>>) attributes {dimension_semantics = [#tpu.dimension_semantics<parallel>], iteration_bounds = array<i64: 4>, scalar_prefetch = 0 : i64, scratch_operands = 0 : i64, tpu.core_type = #tpu.core_type<tc>, window_params = [{transform_indices = @transform_0, window_bounds = array<i64: 4, 16, 16>}, {pipeline_mode = #tpu.pipeline_mode<synchronous>, transform_indices = @transform_1, window_bounds = array<i64: 1, 16, 16>}, {transform_indices = @transform_2, window_bounds = array<i64: 4, 16, 16>}]} {
    %c0 = arith.constant 0 : index
    %c0_0 = arith.constant 0 : index
    %c0_1 = arith.constant 0 : index
    %0 = vector.load %arg1[%c0, %c0_0, %c0_1] : memref<4x16x16xf32, #tpu.memory_space<vmem>>, vector<4x16x16xf32>
    %1 = arith.truncf %0 : vector<4x16x16xf32> to vector<4x16x16xbf16>
    %cst = arith.constant 2.500000e-01 : f32
    %2 = vector.broadcast %cst : f32 to vector<4x16x16xf32>
    %3 = arith.mulf %0, %2 : vector<4x16x16xf32>
    %4 = arith.truncf %3 : vector<4x16x16xf32> to vector<4x16x16xbf16>
    %5 = tpu.transpose %1, [0, 2, 1] : vector<4x16x16xbf16> -> vector<4x16x16xbf16>
    "tpu.trace_start"() <{level = 10 : i32, message = "hsd,hdt->hst"}> : () -> ()
    %cst_2 = arith.constant dense<0.000000e+00> : vector<4x16x16xf32>
    %6 = tpu.matmul %4, %5, %cst_2 {dimension_numbers = #tpu.dot_dimension_numbers<[2], [1], [1], [2], [0, 0, 0, 1, 1, 2], [0], [0]>} : vector<4x16x16xbf16>, vector<4x16x16xbf16>, vector<4x16x16xf32> -> vector<4x16x16xf32>
    "tpu.trace_stop"() : () -> ()
    %c0_3 = arith.constant 0 : index
    %c0_4 = arith.constant 0 : index
    %c0_5 = arith.constant 0 : index
    %7 = vector.load %arg2[%c0_3, %c0_4, %c0_5] : memref<1x16x16xf32, #tpu.memory_space<vmem>>, vector<1x16x16xf32>
    %8 = vector.shape_cast %7 : vector<1x16x16xf32> to vector<16x16xf32>
    %9 = vector.shape_cast %8 : vector<16x16xf32> to vector<1x16x16xf32>
    %10 = vector.broadcast %9 : vector<1x16x16xf32> to vector<4x16x16xf32>
    %11 = arith.addf %6, %10 : vector<4x16x16xf32>
    %cst_6 = arith.constant dense<0xFF800000> : vector<4x16xf32>
    %12 = vector.multi_reduction <maximumf>, %11, %cst_6 [2] : vector<4x16x16xf32> to vector<4x16xf32>
    %13 = vector.shape_cast %12 : vector<4x16xf32> to vector<4x16x1xf32>
    %14 = vector.broadcast %13 : vector<4x16x1xf32> to vector<4x16x16xf32>
    %15 = arith.subf %11, %14 : vector<4x16x16xf32>
    %16 = math.exp %15 : vector<4x16x16xf32>
    %cst_7 = arith.constant dense<0.000000e+00> : vector<4x16xf32>
    %17 = vector.multi_reduction <add>, %16, %cst_7 [2] : vector<4x16x16xf32> to vector<4x16xf32>
    %18 = vector.shape_cast %17 : vector<4x16xf32> to vector<4x16x1xf32>
    %19 = arith.truncf %16 : vector<4x16x16xf32> to vector<4x16x16xbf16>
    "tpu.trace_start"() <{level = 10 : i32, message = "hst,htd->hsd"}> : () -> ()
    %cst_8 = arith.constant dense<0.000000e+00> : vector<4x16x16xf32>
    %20 = tpu.matmul %19, %1, %cst_8 {dimension_numbers = #tpu.dot_dimension_numbers<[2], [1], [1], [2], [0, 0, 0, 1, 1, 2], [0], [0]>} : vector<4x16x16xbf16>, vector<4x16x16xbf16>, vector<4x16x16xf32> -> vector<4x16x16xf32>
    "tpu.trace_stop"() : () -> ()
    %21 = tpu.reciprocal %18 {approx = true} : vector<4x16x1xf32> -> vector<4x16x1xf32>
    %22 = vector.broadcast %21 : vector<4x16x1xf32> to vector<4x16x16xf32>
    %23 = arith.mulf %20, %22 : vector<4x16x16xf32>
    %c0_9 = arith.constant 0 : index
    %c0_10 = arith.constant 0 : index
    %c0_11 = arith.constant 0 : index
    %24 = vector.load %arg3[%c0_9, %c0_10, %c0_11] : memref<4x16x16xf32, #tpu.memory_space<vmem>>, vector<4x16x16xf32>
    tpu.vector_store %arg3[%c0_9, %c0_10, %c0_11], %23 {strides = array<i32>} : memref<4x16x16xf32, #tpu.memory_space<vmem>>, vector<4x16x16xf32>,
    return
  }
  func.func @transform_0(%arg0: i32) -> (i32, i32, i32) {
    %c0_i32 = arith.constant 0 : i32
    %c0_i32_0 = arith.constant 0 : i32
    %c0_i32_1 = arith.constant 0 : i32
    return %arg0, %c0_i32, %c0_i32_0 : i32, i32, i32
  }
  func.func @transform_1(%arg0: i32) -> (i32, i32, i32) {
    %c0_i32 = arith.constant 0 : i32
    %c0_i32_0 = arith.constant 0 : i32
    %c0_i32_1 = arith.constant 0 : i32
    %c0_i32_2 = arith.constant 0 : i32
    return %c0_i32, %c0_i32_0, %c0_i32_1 : i32, i32, i32
  }
  func.func @transform_2(%arg0: i32) -> (i32, i32, i32) {
    %c0_i32 = arith.constant 0 : i32
    %c0_i32_0 = arith.constant 0 : i32
    %c0_i32_1 = arith.constant 0 : i32
    return %arg0, %c0_i32, %c0_i32_0 : i32, i32, i32
  }
}

</mosaic_0001>

<bundles_post_ra>
// kernel: tpu_custom_call.1
= control target key start
LH: loop header
LB: loop body
LE: loop exit
PB: predicated region body
PF: predicated region fallthrough
CT: control target
= control target key end

     0   :  { %7 = vsyncpa [#allocation3], 0  ;;  %s1394_s0 = inlined_call_operand.hbm [shape: f32[16,16,16], index: 0, kind: input, shape index: {}]   ;;  %s1395_s1 = inlined_call_operand.hbm [shape: f32[1,16,16], index: 1, kind: input, shape index: {}]   ;;  %s1396_s2 = inlined_call_operand.hbm [shape: f32[16,16,16], index: 2, kind: output, shape index: {}]  }
   0x1   :  { %9 = vsyncpa [#allocation3 + $0x1], 0 }
   0x2   :  { %10 = vsyncpa [#allocation6], 0 }
   0x3   :  { %11 = vsyncpa [#allocation4], 0 }
   0x4   :  { %13 = vsyncpa [#allocation4 + $0x1], 0  ;;  %s1113_s9 = smov 0   ;;  %s1115_s10 = smov 0  }
   0x5   :  { %s1117_s11 = smov 0   ;;  %s1119_s12 = smov 0  }
   0x6 LB: > { %s1134_s13 = sadd.s32 4294967295, %s1087_s12   ;;  %s770_s14 = sadd.s32 4294967294, %s1087_s12   ;;  %s1087_s12 = sphi %s1119_s12, %s1415_s12   ;;  %s1083_s11 = sphi %s1117_s11, %s1414_s11   ;;  %s1079_s10 = sphi %s1115_s10, %s1413_s10   ;;  %s1075_s9 = sphi %s1113_s9, %s1412_s9  }
   0x7   : > { %p39_p0 = scmp.ne.s32.totalorder %s1079_s10, %s1075_s9  ;;  %p1397_p1 = scmp.eq.s32.totalorder %s1134_s13, 0 }
   0x8   : > { %p90_p3 = scmp.eq.s32.totalorder %s770_s14, 3  ;;  %p771_p5 = scmp.ge.s32.totalorder %s1087_s12, 1 }
   0x9   : > { %p1143_p4 = por %p1397_p1, %p39_p0  ;;  %p97_p7 = scmp.lt.s32.totalorder %s1087_s12, 5 }
   0xa   : > { %p1148_p6 = por %p90_p3, %p39_p0  ;;  %s1089_s18 = smov [#allocation5]  }
   0xb   : > { %s1400_s15 = scalar_select %p1143_p4, 1, 0 }
   0xc   : > { %s1401_s16 = scalar_select %p1148_p6, 1, 0 }
   0xd   : > { %p1153_p8 = pnand %p771_p5, %p97_p7  ;;  %s109_s19 = sshll.u32 %s1089_s18, 4  ;;  %s110_s19 = int_to_ptr.vmem [resolvable:$true] %s109_s19 }
   0xe   : > { %s1166_s21 = sadd.s32 1, %s1087_s12   ;;  %s26_s22 = sadd.s32 1, %s1083_s11 }
   0xf   : > { %s1402_s17 = scalar_select %p1153_p8, 1, 0 }
  0x10   : > { %p872_p9 = pneg %p1153_p8  ;;  %s23_s23 = ssub.s32 %s1087_s12, %s1166_s21 }
  0x11   : > { %s959_s26 = scalar_lea.hbm %s1395_s1, 256 }
  0x12   : > { %p1161_p10 = pnand %p872_p9, %p1397_p1  ;;  %p960_p11 = scmp.ne.s32.totalorder %s1395_s1, %s959_s26 }
  0x13   : > { %p966_p3 = scmp.lt.u32.totalorder %s959_s26, %s1395_s1 }
  0x14   : > { %p961_p12 = pneg %p1161_p10 }
  0x16   : > { %p962_p13 = pnand %p961_p12, %p960_p11 }
  0x18   : > { %p963_p0 = pneg %p962_p13 }
  0x1a   : > { %p968_p5 = pnand %p966_p3, %p963_p0 }
  0x1c   : > { %971 = shalt.err (!%p968_p5)
}
  0x1d   : > { %s972_s3 = scalar_lea.vmem %s110_s19, 256  ;;  %p980_p2 = scmp.lt.s32.totalorder %s110_s19, %s110_s19 }
  0x1e   : > { %p973_p7 = scmp.ne.s32.totalorder %s110_s19, %s972_s3  ;;  %p981_p6 = scmp.lt.s32.totalorder %s972_s3, %s972_s3 }
  0x20   : > { %p975_p9 = pnand %p973_p7, %p961_p12  ;;  %p982_p4 = por %p981_p6, %p980_p2 }
  0x22   : > { %p976_p1 = pneg %p975_p9 }
  0x24   : > { %p983_p8 = pnand %p982_p4, %p976_p1 }
  0x26   : > { %986 = shalt.err (!%p983_p8)
}
  0x27   : > { %s1090_s4 = smov 128   ;;  %s1091_s5 = smov 8  }
  0x28   : > { %875 = dma.hbm_to_vmem [thread:$0]  (!%p1161_p10), %s1395_s1, 256, %s110_s19, [#allocation6], %s1090_s4, %s1090_s4, %s1091_s5  }
  0x29   : > { %p24_p1 = scmp.eq.s32.totalorder %s23_s23, 0  ;;  %p33_p2 = scmp.ne.s32.totalorder %s1083_s11, %s1079_s10 }
  0x2a   : > { %p34_p4 = scmp.eq.s32.totalorder %s1087_s12, 0  ;;  %p885_p6 = scmp.lt.s32.totalorder %s1087_s12, 4 }
  0x2b   : > { %s1195_s8 = scalar_select %p24_p1, %s1083_s11, %s26_s22  }
  0x2c   : > { %p35_p8 = por %p34_p4, %p33_p2  ;;  %p1404_p11 = scmp.eq.s32.totalorder %s1134_s13, 3 }
  0x2d   : > { %s123_s18 = sand.u32 1, %s1083_s11   ;;  %s797_s20 = sshll.u32 %s1087_s12, 10 }
  0x2e   : > { %p1199_p12 = por %p1404_p11, %p33_p2  ;;  %s774_s24 = sshll.u32 %s123_s18, 6 }
  0x2f   : > { %s1208_s27 = scalar_lea.hbm %s1394_s0, %s797_s20  ;;  %s127_s19 = scalar_lea.vmem [#allocation2], %s774_s24 }
  0x30   : > { %s135_s22 = sshll.u32 %s127_s19, 4  ;;  %p1210_p10 = pnand %p885_p6, %p35_p8  ;;  %s1214_s22 = int_to_ptr.vmem [resolvable:$true] %s135_s22 }
  0x31   : > { %s1216_s28 = scalar_lea.sflag [#allocation3], %s123_s18  ;;  %s987_s29 = scalar_lea.hbm %s1208_s27, 1024 }
  0x32   : > { %p988_p13 = scmp.ne.s32.totalorder %s1208_s27, %s987_s29  ;;  %p989_p0 = pneg %p1210_p10 }
  0x33   : > { %s992_s6 = scalar_lea.hbm %s1394_s0, 4096  ;;  %p993_p7 = scmp.lt.u32.totalorder %s1208_s27, %s1394_s0 }
  0x34   : > { %p990_p3 = pnand %p989_p0, %p988_p13  ;;  %p994_p9 = scmp.lt.u32.totalorder %s992_s6, %s987_s29 }
  0x35   : > { %p996_p2 = scmp.lt.u32.totalorder %s987_s29, %s1208_s27 }
  0x36   : > { %p991_p5 = pneg %p990_p3  ;;  %p995_p1 = por %p994_p9, %p993_p7 }
  0x38   : > { %p997_p4 = por %p996_p2, %p995_p1 }
  0x3a   : > { %p998_p6 = pnand %p997_p4, %p991_p5 }
  0x3c   : > { %1001 = shalt.err (!%p998_p6)
}
  0x3d   : > { %s1002_s18 = scalar_lea.vmem %s1214_s22, 1024  ;;  %s1092_s24 = smov [#allocation2]  }
  0x3e   : > { %p1003_p8 = scmp.ne.s32.totalorder %s1214_s22, %s1002_s18  ;;  %s1007_s25 = sshll.u32 %s1092_s24, 4  ;;  %s1008_s25 = int_to_ptr.vmem [resolvable:$false] %s1007_s25 }
  0x3f   : > { %s1009_s26 = scalar_lea.vmem %s1008_s25, 2048  ;;  %p1010_p3 = scmp.lt.s32.totalorder %s1214_s22, %s1008_s25 }
  0x40   : > { %p1005_p11 = pnand %p1003_p8, %p989_p0  ;;  %p1011_p7 = scmp.lt.s32.totalorder %s1009_s26, %s1002_s18 }
  0x42   : > { %p1006_p13 = pneg %p1005_p11  ;;  %p1012_p9 = por %p1011_p7, %p1010_p3 }
  0x44   : > { %p1013_p1 = pnand %p1012_p9, %p1006_p13 }
  0x46   : > { %1016 = shalt.err (!%p1013_p1)
}
  0x47   : > { %879 = dma.hbm_to_vmem [thread:$0]  (!%p1210_p10), %s1208_s27, 1024, %s1214_s22, %s1216_s28, %s1090_s4, %s1090_s4, %s1091_s5  }
  0x48   : > { %p1407_p0 = scmp.ne.s32.totalorder %s1402_s17, 0 }
  0x49   : > { %s1250_s19 = sand.u32 (!%p1407_p0), 1, %s1079_s10   ;;  %p1408_p5 = scmp.ne.s32.totalorder (!%p1407_p0), %s1400_s15, 0 }
  0x4a   : > { %147 = sbr.rel (%p1407_p0) target bundleno = 715 (0x2cb), region = 28  ;;  %s779_s29 = sshll.u32 (!%p1407_p0), %s1250_s19, 6 }
  0x4b   : > { %s150_s30 = scalar_lea.sflag (!%p1407_p0), [#allocation3], %s1250_s19  ;;  %s153_s23 = scalar_lea.vmem (!%p1407_p0), [#allocation2], %s779_s29 }
  0x51   : > { %1062 = dma.done.wait (%p1408_p5), %s150_s30, 1024  }
  0x52   : > { %1064 = vsyncadd (%p1408_p5), %s150_s30, 4294966272  ;;  %p1409_p10 = scmp.eq.s32.totalorder %s1134_s13, 0 }
  0x54   : > { %1066 = dma.done.wait (%p1409_p10), [#allocation6], 256   ;;  %p1410_p2 = pmov %p1409_p10 }
  0x55   : > { %v1093_v0 = vmov 0.0   ;;  %vm1094_vm0 = vmmov 0   ;;  %v181_v1 = vld [vmem:[%s153_s23] sm:$0xff]  ;;  %v182_v2 = vld [vmem:[%s153_s23 + $0x8] sm:$0xff]  ;;  %vm207_vm1 = vcmask 130048   ;;  %v183_v3 = vld [vmem:[%s153_s23 + $0x10] sm:$0xff] }
  0x56   : > { %1068 = vsyncadd (%p1410_p2), [#allocation6], 4294967040  ;;  %816 = vmatprep.subr.bf16.mxu0 %v1093_v0  ;;  %822 = vmatprep.subr.bf16.mxu1 %v1093_v0  ;;  %v189_v4 = vpack.c.bf16 %v182_v2, %v181_v1  ;;  %v184_v5 = vld [vmem:[%s153_s23 + $0x18] sm:$0xff]  ;;  %v185_v7 = vld [vmem:[%s153_s23 + $0x20] sm:$0xff]  ;;  %v193_v9 = vmul.f32 0.25, %v181_v1  ;;  %v194_v10 = vmul.f32 0.25, %v182_v2 }
  0x57   : > { %818 = vmatprep.mubr.msk.bf16.mxu0 %vm1094_vm0, %v1093_v0  ;;  %824 = vmatprep.mubr.msk.bf16.mxu1 %vm1094_vm0, %v1093_v0  ;;  %v190_v6 = vpack.c.bf16 %v184_v5, %v183_v3  ;;  %v186_v8 = vld [vmem:[%s153_s23 + $0x28] sm:$0xff]  ;;  %v187_v12 = vld [vmem:[%s153_s23 + $0x30] sm:$0xff]  ;;  %v188_v13 = vld [vmem:[%s153_s23 + $0x38] sm:$0xff]  ;;  %v195_v14 = vmul.f32 0.25, %v183_v3  ;;  %v196_v15 = vmul.f32 0.25, %v184_v5  ;;  %v197_v23 = vmul.f32 0.25, %v185_v7 }
  0x58   : > { %v212_v11 = vsel %vm207_vm1, %v189_v4, 0  ;;  %v1273_v17 = vpack.c.bf16 %v186_v8, %v185_v7  ;;  %v1276_v18 = vpack.c.bf16 %v188_v13, %v187_v12  ;;  %v201_v19 = vpack.c.bf16 %v194_v10, %v193_v9  ;;  %v205_v29 = vld [vmem:[#allocation5] sm:$0xff]  ;;  %v206_v31 = vld [vmem:[#allocation5 + $0x8] sm:$0xff]  ;;  %s1326_s15 = scalar_lea.vmem [#allocation7], %s779_s29  ;;  %s799_s17 = sshll.u32 %s1134_s13, 10 }
  0x59   : > { %817 = vmatpush3.bf16.xpose.msra.mxu0 %v212_v11  ;;  %v259_v16 = vsel %vm207_vm1, %v190_v6, 0  ;;  %v202_v20 = vpack.c.bf16 %v196_v15, %v195_v14  ;;  %v198_v24 = vmul.f32 0.25, %v186_v8  ;;  %v199_v25 = vmul.f32 0.25, %v187_v12  ;;  %s687_s4 = sshll.u32 %s1326_s15, 4  ;;  %s1343_s22 = scalar_lea.hbm %s1396_s2, %s799_s17  ;;  %s1345_s4 = int_to_ptr.vmem [resolvable:$true] %s687_s4 }
  0x5a   : > { %823 = vmatpush3.bf16.xpose.msra.mxu1 %v259_v16  ;;  %828 = vmatprep.subr.bf16.mxu0 %v1093_v0  ;;  %v306_v21 = vsel %vm207_vm1, %v1273_v17, 0  ;;  %v353_v22 = vsel %vm207_vm1, %v1276_v18, 0  ;;  %v200_v26 = vmul.f32 0.25, %v188_v13  ;;  %s673_s13 = scalar_lea.sflag [#allocation4], %s1250_s19  ;;  %s1017_s28 = scalar_lea.vmem %s1345_s4, 1024 }
  0x5b   : > { %834 = vmatprep.subr.bf16.mxu1 %v1093_v0  ;;  %v203_v27 = vpack.c.bf16 %v198_v24, %v197_v23  ;;  %p1018_p4 = scmp.ne.s32.totalorder %s1345_s4, %s1017_s28  ;;  %s1095_s3 = smov [#allocation7]  }
  0x5c   : > { %v204_v28 = vpack.c.bf16 %v200_v26, %v199_v25  ;;  %s1021_s6 = sshll.u32 %s1095_s3, 4  ;;  %s1022_s6 = int_to_ptr.vmem [resolvable:$false] %s1021_s6 }
  0x5d   : > { %p1019_p6 = pnand %p1018_p4, %p1199_p12  ;;  %s1023_s7 = scalar_lea.vmem %s1022_s6, 2048 }
  0x5e   : > { %p1024_p11 = scmp.lt.s32.totalorder %s1345_s4, %s1022_s6  ;;  %p1025_p13 = scmp.lt.s32.totalorder %s1023_s7, %s1017_s28 }
  0x5f   : > { %p1020_p8 = pneg %p1019_p6 }
  0x60   : > { %819 = vmatmul.mubr.msk.bf16.vlgmr.msra.gmra.mrb[0].mxu0 %vm207_vm1, %v201_v19  ;;  %p1026_p3 = por %p1025_p13, %p1024_p11 }
  0x61   : > { %825 = vmatmul.mubr.msk.bf16.vlgmr.msra.gmra.mrb[0].mxu1 %vm207_vm1, %v202_v20  ;;  %829 = vmatpush3.bf16.xpose.msra.mxu0 %v306_v21 }
  0x62   : > { %835 = vmatpush3.bf16.xpose.msra.mxu1 %v353_v22  ;;  %830 = vmatprep.mubr.msk.bf16.mxu0 %vm1094_vm0, %v1093_v0  ;;  %p1027_p7 = pnand %p1026_p3, %p1020_p8 }
  0x63   : > { %836 = vmatprep.mubr.msk.bf16.mxu1 %vm1094_vm0, %v1093_v0  ;;  %840 = vmatprep.subr.bf16.mxu0 %v1093_v0 }
  0x64   : > { %846 = vmatprep.subr.bf16.mxu1 %v1093_v0 }
  0x68   : > { %831 = vmatmul.mubr.msk.bf16.vlgmr.msra.gmra.mrb[4].mxu0 %vm207_vm1, %v203_v27 }
  0x69   : > { %837 = vmatmul.mubr.msk.bf16.vlgmr.msra.gmra.mrb[4].mxu1 %vm207_vm1, %v204_v28  ;;  %841 = vmatpush3.bf16.msra.mxu0 %v189_v4 }
  0x6a   : > { %847 = vmatpush3.bf16.msra.mxu1 %v190_v6  ;;  %842 = vmatprep.mubr.msk.bf16.mxu0 %vm1094_vm0, %v1093_v0 }
  0x6b   : > { %848 = vmatprep.mubr.msk.bf16.mxu1 %vm1094_vm0, %v1093_v0  ;;  %852 = vmatprep.subr.bf16.mxu0 %v1093_v0 }
  0x6c   : > { %858 = vmatprep.subr.bf16.mxu1 %v1093_v0 }
 0x133   : > { %v248_v30 = vpop.f32.mrb[0].mxu0 }
 0x134   : > { %v249_v32 = vadd.f32 %v248_v30, %v205_v29  ;;  %v295_v33 = vpop.f32.mrb[0].mxu1  ;;  %v820_v34 = vpop.f32.mrb[1].mxu0 }
 0x135   : > { %v296_v35 = vadd.f32 %v295_v33, %v205_v29  ;;  %v826_v36 = vpop.f32.mrb[1].mxu1  ;;  %v251_v37 = vpop.f32.mrb[2].mxu0 }
 0x136   : > { %v252_v38 = vadd.f32 %v251_v37, %v206_v31  ;;  %v298_v39 = vpop.f32.mrb[2].mxu1  ;;  %v821_v40 = vpop.f32.mrb[3].mxu0  ;;  %v396_v41 = vsel %vm207_vm1, %v249_v32, -inf }
 0x137   : > { %v299_v42 = vadd.f32 %v298_v39, %v206_v31  ;;  %v827_v43 = vpop.f32.mrb[3].mxu1  ;;  %v402_v44 = vsel %vm207_vm1, %v296_v35, -inf  ;;  %397 = vmax.xlane.f32.xlu0 %v396_v41 }
 0x138   : > { %403 = vmax.xlane.f32.xlu1 %v402_v44  ;;  %v399_v45 = vsel %vm207_vm1, %v252_v38, -inf }
 0x139   : > { %v405_v46 = vsel %vm207_vm1, %v299_v42, -inf }
 0x13b   : > { %400 = vmax.xlane.f32.xlu0 %v399_v45  ;;  %v342_v47 = vpop.f32.mrb[4].mxu0 }
 0x13c   : > { %406 = vmax.xlane.f32.xlu1 %v405_v46  ;;  %v343_v48 = vadd.f32 %v342_v47, %v205_v29  ;;  %v832_v49 = vpop.f32.mrb[5].mxu0  ;;  %v389_v50 = vpop.f32.mrb[4].mxu1 }
 0x13d   : > { %v345_v51 = vpop.f32.mrb[6].mxu0  ;;  %v390_v52 = vadd.f32 %v389_v50, %v205_v29  ;;  %v838_v53 = vpop.f32.mrb[5].mxu1 }
 0x13e   : > { %v346_v54 = vadd.f32 %v345_v51, %v206_v31  ;;  %v833_v55 = vpop.f32.mrb[7].mxu0  ;;  %v392_v56 = vpop.f32.mrb[6].mxu1  ;;  %v408_v57 = vsel %vm207_vm1, %v343_v48, -inf }
 0x13f   : > { %409 = vmax.xlane.f32.xlu0 %v408_v57  ;;  %v839_v58 = vpop.f32.mrb[7].mxu1  ;;  %v393_v59 = vadd.f32 %v392_v56, %v206_v31  ;;  %v414_v61 = vsel %vm207_vm1, %v390_v52, -inf }
 0x140   : > { %v411_v60 = vsel %vm207_vm1, %v346_v54, -inf }
 0x141   : > { %412 = vmax.xlane.f32.xlu1 %v411_v60  ;;  %v417_v62 = vsel %vm207_vm1, %v393_v59, -inf }
 0x143   : > { %415 = vmax.xlane.f32.xlu0 %v414_v61 }
 0x145   : > { %418 = vmax.xlane.f32.xlu1 %v417_v62 }
 0x1c4   : > { %v398_v63 = vpop.xlane.xlu0 %397 }
 0x1c5   : > { %v404_v1 = vpop.xlane.xlu1 %403  ;;  %v420_v2 = vsub.f32 %v249_v32, %v398_v63 }
 0x1c6   : > { %v422_v3 = vsub.f32 %v296_v35, %v404_v1 }
 0x1c7   : > { %v428_v4 = vmul.f32 1.442695, %v420_v2 }
 0x1c8   : > { %v432_v5 = vmul.f32 1.442695, %v422_v3  ;;  %v401_v6 = vpop.xlane.xlu0 %400 }
 0x1c9   : > { %927 = vpow2.f32 %v428_v4  ;;  %v407_v7 = vpop.xlane.xlu1 %406  ;;  %v421_v8 = vsub.f32 %v252_v38, %v401_v6 }
 0x1ca   : > { %v423_v9 = vsub.f32 %v299_v42, %v407_v7  ;;  %929 = vpow2.f32 %v432_v5 }
 0x1cb   : > { %v430_v10 = vmul.f32 1.442695, %v421_v8 }
 0x1cc   : > { %v434_v11 = vmul.f32 1.442695, %v423_v9  ;;  %v410_v12 = vpop.xlane.xlu0 %409 }
 0x1cd   : > { %931 = vpow2.f32 %v430_v10  ;;  %v424_v13 = vsub.f32 %v343_v48, %v410_v12 }
 0x1ce   : > { %933 = vpow2.f32 %v434_v11  ;;  %v413_v14 = vpop.xlane.xlu1 %412 }
 0x1cf   : > { %v436_v15 = vmul.f32 1.442695, %v424_v13  ;;  %v425_v16 = vsub.f32 %v346_v54, %v413_v14 }
 0x1d0   : > { %v416_v19 = vpop.xlane.xlu0 %415 }
 0x1d1   : > { %935 = vpow2.f32 %v436_v15  ;;  %v438_v20 = vmul.f32 1.442695, %v425_v16  ;;  %v426_v21 = vsub.f32 %v390_v52, %v416_v19 }
 0x1d2   : > { %v419_v22 = vpop.xlane.xlu1 %418 }
 0x1d3   : > { %v928_v23 = vpop.eup %927  ;;  %937 = vpow2.f32 %v438_v20  ;;  %v440_v24 = vmul.f32 1.442695, %v426_v21  ;;  %v427_v25 = vsub.f32 %v393_v59, %v419_v22 }
 0x1d4   : > { %v444_v26 = vsel %vm207_vm1, %v928_v23, 0.0  ;;  %v930_v27 = vpop.eup %929 }
 0x1d5   : > { %939 = vpow2.f32 %v440_v24  ;;  %v442_v28 = vmul.f32 1.442695, %v427_v25  ;;  %445 = vadd.xlane.f32.xlu0 %v444_v26  ;;  %v450_v31 = vsel %vm207_vm1, %v930_v27, 0.0 }
 0x1d7   : > { %v932_v29 = vpop.eup %931  ;;  %941 = vpow2.f32 %v442_v28 }
 0x1d8   : > { %v934_v30 = vpop.eup %933  ;;  %v447_v32 = vsel %vm207_vm1, %v932_v29, 0.0  ;;  %v468_v33 = vpack.c.bf16 %v932_v29, %v928_v23 }
 0x1d9   : > { %451 = vadd.xlane.f32.xlu0 %v450_v31  ;;  %448 = vadd.xlane.f32.xlu1 %v447_v32  ;;  %v469_v34 = vpack.c.bf16 %v934_v30, %v930_v27  ;;  %v453_v37 = vsel %vm207_vm1, %v934_v30, 0.0 }
 0x1da   : > { %843 = vmatmul.mubr.msk.bf16.vlgmr.msra.gmra.mrb[8].mxu0 %vm207_vm1, %v468_v33 }
 0x1db   : > { %v936_v35 = vpop.eup %935  ;;  %849 = vmatmul.mubr.msk.bf16.vlgmr.msra.gmra.mrb[8].mxu1 %vm207_vm1, %v469_v34  ;;  %853 = vmatpush3.bf16.msra.mxu0 %v1273_v17 }
 0x1dc   : > { %859 = vmatpush3.bf16.msra.mxu1 %v1276_v18  ;;  %v456_v36 = vsel %vm207_vm1, %v936_v35, 0.0  ;;  %854 = vmatprep.mubr.msk.bf16.mxu0 %vm1094_vm0, %v1093_v0 }
 0x1dd   : > { %v938_v38 = vpop.eup %937  ;;  %457 = vadd.xlane.f32.xlu0 %v456_v36  ;;  %454 = vadd.xlane.f32.xlu1 %v453_v37 }
 0x1de   : > { %860 = vmatprep.mubr.msk.bf16.mxu1 %vm1094_vm0, %v1093_v0  ;;  %v459_v17 = vsel %vm207_vm1, %v938_v38, 0.0  ;;  %v470_v41 = vpack.c.bf16 %v938_v38, %v936_v35 }
 0x1df   : > { %v940_v39 = vpop.eup %939 }
 0x1e0   : > { %v462_v40 = vsel %vm207_vm1, %v940_v39, 0.0 }
 0x1e1   : > { %v942_v18 = vpop.eup %941  ;;  %463 = vadd.xlane.f32.xlu0 %v462_v40  ;;  %460 = vadd.xlane.f32.xlu1 %v459_v17 }
 0x1e2   : > { %855 = vmatmul.mubr.msk.bf16.vlgmr.msra.gmra.mrb[12].mxu0 %vm207_vm1, %v470_v41  ;;  %v471_v42 = vpack.c.bf16 %v942_v18, %v940_v39  ;;  %v465_v43 = vsel %vm207_vm1, %v942_v18, 0.0 }
 0x1e4   : > { %861 = vmatmul.mubr.msk.bf16.vlgmr.msra.gmra.mrb[12].mxu1 %vm207_vm1, %v471_v42 }
 0x1e5   : > { %466 = vadd.xlane.f32.xlu1 %v465_v43 }
 0x262   : > { %v446_v44 = vpop.xlane.xlu0 %445 }
 0x263   : > { %943 = vrcp.f32 %v446_v44 }
 0x266   : > { %v449_v45 = vpop.xlane.xlu1 %448  ;;  %v452_v0 = vpop.xlane.xlu0 %451 }
 0x267   : > { %945 = vrcp.f32 %v452_v0 }
 0x268   : > { %947 = vrcp.f32 %v449_v45 }
 0x26a   : > { %v455_v46 = vpop.xlane.xlu1 %454  ;;  %v458_v47 = vpop.xlane.xlu0 %457 }
 0x26b   : > { %949 = vrcp.f32 %v455_v46 }
 0x26c   : > { %951 = vrcp.f32 %v458_v47 }
 0x26d   : > { %v944_v51 = vpop.eup %943 }
 0x26e   : > { %v461_v48 = vpop.xlane.xlu1 %460  ;;  %v464_v49 = vpop.xlane.xlu0 %463 }
 0x26f   : > { %953 = vrcp.f32 %v464_v49 }
 0x270   : > { %955 = vrcp.f32 %v461_v48 }
 0x271   : > { %v946_v53 = vpop.eup %945 }
 0x272   : > { %v467_v50 = vpop.xlane.xlu1 %466  ;;  %v948_v57 = vpop.eup %947 }
 0x273   : > { %957 = vrcp.f32 %v467_v50 }
 0x275   : > { %v950_v61 = vpop.eup %949 }
 0x276   : > { %v952_v4 = vpop.eup %951 }
 0x279   : > { %v954_v6 = vpop.eup %953 }
 0x27a   : > { %v956_v9 = vpop.eup %955 }
 0x27d   : > { %v958_v16 = vpop.eup %957 }
 0x2ad   : > { %v509_v52 = vpop.f32.mrb[8].mxu0 }
 0x2ae   : > { %v656_v54 = vmul.f32 %v944_v51, %v509_v52  ;;  %v553_v55 = vpop.f32.mrb[8].mxu1  ;;  %v844_v56 = vpop.f32.mrb[9].mxu0 }
 0x2af   : > { %v658_v58 = vmul.f32 %v946_v53, %v553_v55  ;;  %v850_v59 = vpop.f32.mrb[9].mxu1  ;;  %v512_v60 = vpop.f32.mrb[10].mxu0 }
 0x2b0   : > { %664 = vst.msk [vmem:[%s1326_s15] sm:$0xff] %vm207_vm1, %v656_v54  ;;  %v657_v62 = vmul.f32 %v948_v57, %v512_v60  ;;  %v556_v63 = vpop.f32.mrb[10].mxu1  ;;  %v845_v1 = vpop.f32.mrb[11].mxu0 }
 0x2b1   : > { %666 = vst.msk [vmem:[%s1326_s15 + $0x10] sm:$0xff] %vm207_vm1, %v658_v58  ;;  %v659_v2 = vmul.f32 %v950_v61, %v556_v63  ;;  %v851_v3 = vpop.f32.mrb[11].mxu1 }
 0x2b2   : > { %665 = vst.msk [vmem:[%s1326_s15 + $0x8] sm:$0xff] %vm207_vm1, %v657_v62 }
 0x2b3   : > { %667 = vst.msk [vmem:[%s1326_s15 + $0x18] sm:$0xff] %vm207_vm1, %v659_v2 }
 0x2b5   : > { %v597_v5 = vpop.f32.mrb[12].mxu0 }
 0x2b6   : > { %v660_v7 = vmul.f32 %v952_v4, %v597_v5  ;;  %v856_v8 = vpop.f32.mrb[13].mxu0 }
 0x2b7   : > { %v600_v10 = vpop.f32.mrb[14].mxu0  ;;  %v641_v11 = vpop.f32.mrb[12].mxu1 }
 0x2b8   : > { %668 = vst.msk [vmem:[%s1326_s15 + $0x20] sm:$0xff] %vm207_vm1, %v660_v7  ;;  %v661_v12 = vmul.f32 %v956_v9, %v600_v10  ;;  %v662_v13 = vmul.f32 %v954_v6, %v641_v11  ;;  %v857_v14 = vpop.f32.mrb[15].mxu0  ;;  %v862_v15 = vpop.f32.mrb[13].mxu1 }
 0x2b9   : > { %v644_v19 = vpop.f32.mrb[14].mxu1 }
 0x2ba   : > { %669 = vst.msk [vmem:[%s1326_s15 + $0x28] sm:$0xff] %vm207_vm1, %v661_v12  ;;  %670 = vst.msk [vmem:[%s1326_s15 + $0x30] sm:$0xff] %vm207_vm1, %v662_v13  ;;  %v663_v20 = vmul.f32 %v958_v16, %v644_v19  ;;  %v863_v21 = vpop.f32.mrb[15].mxu1 }
 0x2bc   : > { %671 = vst.msk [vmem:[%s1326_s15 + $0x38] sm:$0xff] %vm207_vm1, %v663_v20 }
 0x2bd   : > { %1030 = shalt.err (!%p1027_p7)
}
 0x2be   : > { %s1031_s20 = scalar_lea.hbm %s1343_s22, 1024  ;;  %s1035_s25 = scalar_lea.hbm %s1396_s2, 4096 }
 0x2bf   : > { %p1032_p9 = scmp.ne.s32.totalorder %s1343_s22, %s1031_s20  ;;  %p1036_p5 = scmp.lt.u32.totalorder %s1343_s22, %s1396_s2 }
 0x2c0   : > { %p1037_p10 = scmp.lt.u32.totalorder %s1035_s25, %s1031_s20  ;;  %p1039_p4 = scmp.lt.u32.totalorder %s1031_s20, %s1343_s22 }
 0x2c1   : > { %p1033_p1 = pnand %p1032_p9, %p1199_p12 }
 0x2c2   : > { %p1038_p2 = por %p1037_p10, %p1036_p5 }
 0x2c3   : > { %p1034_p0 = pneg %p1033_p1 }
 0x2c4   : > { %p1040_p6 = por %p1039_p4, %p1038_p2 }
 0x2c6   : > { %p1041_p8 = pnand %p1040_p6, %p1034_p0 }
 0x2c8   : > { %1044 = shalt.err (!%p1041_p8)
}
 0x2c9   : > { %s1096_s30 = smov 128   ;;  %s1097_s23 = smov 8  }
 0x2ca   : > { %870 = dma.vmem_to_hbm [thread:$0]  (%p1199_p12), %s1345_s4, 1024, %s1343_s22, %s673_s13, %s1096_s30, %s1096_s30, %s1097_s23  }
 0x2cb PF: > { %p887_p11 = scmp.ge.s32.totalorder %s1087_s12, 2  ;;  %s702_s15 = sand.u32 1, %s1075_s9  }
 0x2cc   : > { %p1411_p13 = scmp.ne.s32.totalorder %s1401_s16, 0  ;;  %s703_s17 = scalar_lea.sflag [#allocation4], %s702_s15 }
 0x2ce   : > { %p881_p3 = pnand %p887_p11, %p1411_p13 }
 0x2d0   : > { %1070 = dma.done.wait (!%p881_p3), %s703_s17, 1024  }
 0x2d1   : > { %1072 = vsyncadd (!%p881_p3), %s703_s17, 4294966272  ;;  %p16_p7 = scmp.ge.s32.totalorder %s1166_s21, 6   ;;  %s1412_s9 = smov %s1079_s10 }
 0x2d2   : > { %s1413_s10 = smov %s1083_s11  ;;  %s1414_s11 = smov %s1195_s8 }
 0x2d3   : > { %s1415_s12 = smov %s1166_s21  ;;  %18 = sbr.rel (!%p16_p7) target bundleno = 6 (0x6), region = 77 }
 0x2da   :  { %708 = vsyncpa [#allocation3], 1 }
 0x2db   :  { %710 = vsyncpa [#allocation3 + $0x1], 1 }
 0x2dc   :  { %711 = vsyncpa [#allocation6], 1 }
 0x2dd   :  { %712 = vsyncpa [#allocation4], 1 }
 0x2de   :  { %714 = vsyncpa [#allocation4 + $0x1], 1 }

</bundles_post_ra>
